<compile_context>
chip_gen: v7x
topology: tpu7x:2x2x1
jax: 0.10.0
libtpu: 0.0.40
codegen_flags: <defaults>
</compile_context>

<pallas_src>
import functools

import jax
import jax.numpy as jnp
from jax.experimental import pallas as pl
from jax.experimental.pallas import tpu as pltpu

DIM = 32
NUM_HEADS = 4
HEAD_DIM = DIM // NUM_HEADS
MLP_RATIO = 4.0
MLP_HIDDEN = int(DIM * MLP_RATIO)
EPS = 1e-5                     # PyTorch nn.LayerNorm default
_UNROLL_DEPTH = 4              # static unroll threshold for the in-kernel layer loop


def _layernorm(x, gamma, beta):
    mu = jnp.mean(x, axis=-1, keepdims=True)
    xc = x - mu
    var = jnp.mean(xc * xc, axis=-1, keepdims=True)
    return xc * jax.lax.rsqrt(var + EPS) * gamma + beta


def reblock_kernel(x_ref, ln1g_ref, ln1b_ref, wq_ref, wk_ref, wv_ref,
                   wo_ref, bo_ref, ln2g_ref, ln2b_ref,
                   w1_ref, b1_ref, w2_ref, b2_ref, o_ref,
                   *, depth, num_heads, head_dim, tokens_per_item):
    rows = x_ref.shape[0]
    n_items = rows // tokens_per_item          # batch elements in this row tile

    def split_heads(t):
        # (rows, H*hd) -> (H*n_items, N, hd); lane slices + leading concat only
        # (no lane<->sublane 4-D transpose), head-major along the new batch axis.
        return jnp.concatenate(
            [t[:, h * head_dim:(h + 1) * head_dim]
               .reshape(n_items, tokens_per_item, head_dim)
             for h in range(num_heads)], axis=0)

    def merge_heads(t):
        # (H*n_items, N, hd) -> (rows, H*hd): leading slices + one lane concat.
        return jnp.concatenate(
            [t[h * n_items:(h + 1) * n_items].reshape(rows, head_dim)
             for h in range(num_heads)], axis=-1)

    def layer(x, l):
        # ---------------- Attention branch: x + Attn(LN1(x)) ----------------
        h = _layernorm(x, ln1g_ref[l], ln1b_ref[l])            # f32
        hb = h.astype(jnp.bfloat16)                            # single cast
        # full-width QKV dots (scale pre-folded into wq; qkv_bias=False)
        q = jnp.dot(hb, wq_ref[l], preferred_element_type=jnp.float32)   # (R, D)
        k = jnp.dot(hb, wk_ref[l], preferred_element_type=jnp.float32)
        v = jnp.dot(hb, wv_ref[l], preferred_element_type=jnp.float32)

        q3 = split_heads(q.astype(jnp.bfloat16))               # (B*H, N, hd)
        k3 = split_heads(k.astype(jnp.bfloat16))
        v3 = split_heads(v.astype(jnp.bfloat16))

        # one scores einsum + one softmax + one p@v for ALL heads
        s = jnp.einsum("bqd,bkd->bqk", q3, k3,
                       preferred_element_type=jnp.float32)     # (B*H, N, N) f32
        s = s - jnp.max(s, axis=-1, keepdims=True)
        p = jnp.exp(s)
        p = p * pl.reciprocal(jnp.sum(p, axis=-1, keepdims=True), approx=True)
        o3 = jnp.einsum("bqk,bkd->bqd", p.astype(jnp.bfloat16), v3,
                        preferred_element_type=jnp.float32)    # (B*H, N, hd)

        o2 = merge_heads(o3.astype(jnp.bfloat16))              # (R, D) bf16
        attn = jnp.dot(o2, wo_ref[l], preferred_element_type=jnp.float32)
        x = x + attn + bo_ref[l]                               # proj bias + residual

        # ---------------- MLP branch: x + MLP(LN2(x)) ----------------
        h2 = _layernorm(x, ln2g_ref[l], ln2b_ref[l])
        m = jnp.dot(h2.astype(jnp.bfloat16), w1_ref[l],
                    preferred_element_type=jnp.float32) + b1_ref[l]
        # TODO(synk): PyTorch nn.GELU default is exact erf GELU; tanh approximation used
        # for robust Mosaic lowering of the transcendental.
        m = jax.nn.gelu(m, approximate=True)
        m = jnp.dot(m.astype(jnp.bfloat16), w2_ref[l],
                    preferred_element_type=jnp.float32) + b2_ref[l]
        return x + m

    x = x_ref[...].astype(jnp.float32)
    if depth <= _UNROLL_DEPTH:
        for l in range(depth):                     # static unroll (depth is tiny here)
            x = layer(x, l)
    else:
        x = jax.lax.fori_loop(0, depth, lambda l, xc: layer(xc, l), x)
    o_ref[...] = x.astype(o_ref.dtype)


def reblock_forward(x, params, *, batch_tile=None):
    """ReBlock forward. x: (B, N, DIM) float32. params: stacked per-layer weights."""
    B, N, D = x.shape
    assert D == DIM
    depth = params["ln1_g"].shape[0]

    if batch_tile is None:
        batch_tile = B
        # Split the parallel row-tile axis so v7x's second TensorCore gets work,
        # as long as each tile stays sublane-aligned (multiple of 8 rows).
        if B % 2 == 0 and ((B // 2) * N) % 8 == 0:
            batch_tile = B // 2
        # TODO(synk): for large B, grow batch_tile so rows_per_tile >= 256 (MXU fill).
    assert B % batch_tile == 0
    rows_per_tile = batch_tile * N
    assert rows_per_tile % 8 == 0 or batch_tile == B

    x2 = x.reshape(B * N, D)                       # flatten rows in the wrapper
    grid = (B // batch_tile,)                      # row tiles only; layers loop in-kernel

    act_map = lambda i: (i, 0)
    full3 = lambda i: (0, 0, 0)                    # whole stacked weight, resident in VMEM

    in_specs = [
        pl.BlockSpec((rows_per_tile, D), act_map),                   # x
        pl.BlockSpec((depth, 1, D), full3),                          # ln1 gamma
        pl.BlockSpec((depth, 1, D), full3),                          # ln1 beta
        pl.BlockSpec((depth, D, D), full3),                          # W_q (scale folded)
        pl.BlockSpec((depth, D, D), full3),                          # W_k
        pl.BlockSpec((depth, D, D), full3),                          # W_v
        pl.BlockSpec((depth, D, D), full3),                          # W_proj
        pl.BlockSpec((depth, 1, D), full3),                          # b_proj
        pl.BlockSpec((depth, 1, D), full3),                          # ln2 gamma
        pl.BlockSpec((depth, 1, D), full3),                          # ln2 beta
        pl.BlockSpec((depth, D, MLP_HIDDEN), full3),                 # W_fc1
        pl.BlockSpec((depth, 1, MLP_HIDDEN), full3),                 # b_fc1
        pl.BlockSpec((depth, MLP_HIDDEN, D), full3),                 # W_fc2
        pl.BlockSpec((depth, 1, D), full3),                          # b_fc2
    ]

    kernel = functools.partial(reblock_kernel, depth=depth, num_heads=NUM_HEADS,
                               head_dim=HEAD_DIM, tokens_per_item=N)

    out2 = pl.pallas_call(
        kernel,
        out_shape=jax.ShapeDtypeStruct((B * N, D), x.dtype),
        grid_spec=pltpu.PrefetchScalarGridSpec(
            num_scalar_prefetch=0,
            grid=grid,
            in_specs=in_specs,
            out_specs=pl.BlockSpec((rows_per_tile, D), act_map),
        ),
        compiler_params=pltpu.CompilerParams(
            dimension_semantics=("parallel",),
            vmem_limit_bytes=32 * 1024 * 1024,
        ),
    )(x2, params["ln1_g"], params["ln1_b"], params["w_q"], params["w_k"],
      params["w_v"], params["w_proj"], params["b_proj"], params["ln2_g"],
      params["ln2_b"], params["w_fc1"], params["b_fc1"], params["w_fc2"],
      params["b_fc2"])

    return out2.reshape(B, N, D)


def init_reblock_params(key, depth=1):
    """Random ReBlock params, stacked over depth, in the kernel's layout.

    PyTorch mapping (per layer l): W_qkv^T (D, 3D) with columns ordered (q|k|v, head,
    head_dim) is split into three (D, D) slabs (q gets the head_dim**-0.5 scale folded
    in); W_proj^T is (D, D); linears are stored as y = x @ W.
    """
    std = 0.02
    scale = HEAD_DIM ** -0.5
    ks = jax.random.split(key, 10)
    rnd = lambda k, shape, s=std: s * jax.random.normal(k, shape, jnp.float32)

    w_qkv = rnd(ks[0], (depth, DIM, 3 * DIM))
    w_proj = rnd(ks[1], (depth, DIM, DIM))
    w_fc1 = rnd(ks[2], (depth, DIM, MLP_HIDDEN))
    w_fc2 = rnd(ks[3], (depth, MLP_HIDDEN, DIM))

    w_q = w_qkv[..., 0 * DIM:1 * DIM] * scale      # fold attention scale
    w_k = w_qkv[..., 1 * DIM:2 * DIM]
    w_v = w_qkv[..., 2 * DIM:3 * DIM]

    return {
        "ln1_g": 1.0 + rnd(ks[4], (depth, 1, DIM), 0.05),
        "ln1_b": rnd(ks[5], (depth, 1, DIM), 0.05),
        "w_q": w_q.astype(jnp.bfloat16),
        "w_k": w_k.astype(jnp.bfloat16),
        "w_v": w_v.astype(jnp.bfloat16),
        "w_proj": w_proj.astype(jnp.bfloat16),
        "b_proj": rnd(ks[6], (depth, 1, DIM), 0.05),
        "ln2_g": 1.0 + rnd(ks[7], (depth, 1, DIM), 0.05),
        "ln2_b": rnd(ks[8], (depth, 1, DIM), 0.05),
        "w_fc1": w_fc1.astype(jnp.bfloat16),
        "b_fc1": rnd(ks[9], (depth, 1, MLP_HIDDEN), 0.05),
        "w_fc2": w_fc2.astype(jnp.bfloat16),
        "b_fc2": rnd(jax.random.fold_in(key, 99), (depth, 1, DIM), 0.05),
    }


def reblock_reference(x, p):
    """Pure-JAX f32 reference (same math, same bf16-rounded weight values)."""
    depth = p["ln1_g"].shape[0]
    B, N, D = x.shape
    xf = x.astype(jnp.float32)
    for l in range(depth):
        h = _layernorm(xf, p["ln1_g"][l, 0], p["ln1_b"][l, 0])
        q = h @ p["w_q"][l].astype(jnp.float32)    # scale already folded
        k = h @ p["w_k"][l].astype(jnp.float32)
        v = h @ p["w_v"][l].astype(jnp.float32)

        def split(t):  # (B, N, D) -> (B, H, N, hd)
            return t.reshape(B, N, NUM_HEADS, HEAD_DIM).transpose(0, 2, 1, 3)

        qh, kh, vh = split(q), split(k), split(v)
        s = jnp.einsum("bhqd,bhkd->bhqk", qh, kh)
        prob = jax.nn.softmax(s, axis=-1)
        o = jnp.einsum("bhqk,bhkd->bhqd", prob, vh)
        o = o.transpose(0, 2, 1, 3).reshape(B, N, D)
        attn = o @ p["w_proj"][l].astype(jnp.float32) + p["b_proj"][l, 0]
        xf = xf + attn

        h2 = _layernorm(xf, p["ln2_g"][l, 0], p["ln2_b"][l, 0])
        m = h2 @ p["w_fc1"][l].astype(jnp.float32) + p["b_fc1"][l, 0]
        m = jax.nn.gelu(m, approximate=True)
        m = m @ p["w_fc2"][l].astype(jnp.float32) + p["b_fc2"][l, 0]
        xf = xf + m
    return xf


if __name__ == "__main__":
    key = jax.random.PRNGKey(0)
    kx, kp1, kp2 = jax.random.split(key, 3)

    B, N = 2, 8
    x = jax.random.normal(kx, (B, N, DIM), dtype=jnp.float32)

    # depth=1 (PyTorch ReBlock default) and depth=2 (exercises the in-kernel layer loop)
    for kp, depth in ((kp1, 1), (kp2, 2)):
        params = init_reblock_params(kp, depth=depth)
        out = reblock_forward(x, params)
        jax.block_until_ready(out)
        assert out.shape == (B, N, DIM) and out.dtype == jnp.float32
        ref = reblock_reference(x, params)
        err = float(jnp.max(jnp.abs(out - ref)))
        assert err < 2e-2, f"depth={depth}: max abs err vs reference = {err}"

    print("KERNEL_OK")
</pallas_src>

<mosaic_0001>
module attributes {stable_mosaic.version = 11 : i64} {
  func.func @reblock_kernel(%arg0: i32, %arg1: memref<8x32xf32, #tpu.memory_space<vmem>>, %arg2: memref<1x1x32xf32, #tpu.memory_space<vmem>>, %arg3: memref<1x1x32xf32, #tpu.memory_space<vmem>>, %arg4: memref<1x32x32xbf16, #tpu.memory_space<vmem>>, %arg5: memref<1x32x32xbf16, #tpu.memory_space<vmem>>, %arg6: memref<1x32x32xbf16, #tpu.memory_space<vmem>>, %arg7: memref<1x32x32xbf16, #tpu.memory_space<vmem>>, %arg8: memref<1x1x32xf32, #tpu.memory_space<vmem>>, %arg9: memref<1x1x32xf32, #tpu.memory_space<vmem>>, %arg10: memref<1x1x32xf32, #tpu.memory_space<vmem>>, %arg11: memref<1x32x128xbf16, #tpu.memory_space<vmem>>, %arg12: memref<1x1x128xf32, #tpu.memory_space<vmem>>, %arg13: memref<1x128x32xbf16, #tpu.memory_space<vmem>>, %arg14: memref<1x1x32xf32, #tpu.memory_space<vmem>>, %arg15: memref<8x32xf32, #tpu.memory_space<vmem>>) attributes {dimension_semantics = [#tpu.dimension_semantics<parallel>], iteration_bounds = array<i64: 2>, scalar_prefetch = 0 : i64, scratch_operands = 0 : i64, tpu.core_type = #tpu.core_type<tc>, window_params = [{transform_indices = @transform_0, window_bounds = array<i64: 8, 32>}, {pipeline_mode = #tpu.pipeline_mode<synchronous>, transform_indices = @transform_1, window_bounds = array<i64: 1, 1, 32>}, {pipeline_mode = #tpu.pipeline_mode<synchronous>, transform_indices = @transform_2, window_bounds = array<i64: 1, 1, 32>}, {pipeline_mode = #tpu.pipeline_mode<synchronous>, transform_indices = @transform_3, window_bounds = array<i64: 1, 32, 32>}, {pipeline_mode = #tpu.pipeline_mode<synchronous>, transform_indices = @transform_4, window_bounds = array<i64: 1, 32, 32>}, {pipeline_mode = #tpu.pipeline_mode<synchronous>, transform_indices = @transform_5, window_bounds = array<i64: 1, 32, 32>}, {pipeline_mode = #tpu.pipeline_mode<synchronous>, transform_indices = @transform_6, window_bounds = array<i64: 1, 32, 32>}, {pipeline_mode = #tpu.pipeline_mode<synchronous>, transform_indices = @transform_7, window_bounds = array<i64: 1, 1, 32>}, {pipeline_mode = #tpu.pipeline_mode<synchronous>, transform_indices = @transform_8, window_bounds = array<i64: 1, 1, 32>}, {pipeline_mode = #tpu.pipeline_mode<synchronous>, transform_indices = @transform_9, window_bounds = array<i64: 1, 1, 32>}, {pipeline_mode = #tpu.pipeline_mode<synchronous>, transform_indices = @transform_10, window_bounds = array<i64: 1, 32, 128>}, {pipeline_mode = #tpu.pipeline_mode<synchronous>, transform_indices = @transform_11, window_bounds = array<i64: 1, 1, 128>}, {pipeline_mode = #tpu.pipeline_mode<synchronous>, transform_indices = @transform_12, window_bounds = array<i64: 1, 128, 32>}, {pipeline_mode = #tpu.pipeline_mode<synchronous>, transform_indices = @transform_13, window_bounds = array<i64: 1, 1, 32>}, {transform_indices = @transform_14, window_bounds = array<i64: 8, 32>}]} {
    %c0 = arith.constant 0 : index
    %c0_0 = arith.constant 0 : index
    %0 = vector.load %arg1[%c0, %c0_0] : memref<8x32xf32, #tpu.memory_space<vmem>>, vector<8x32xf32>
    %c0_1 = arith.constant 0 : index
    %c0_2 = arith.constant 0 : index
    %c0_3 = arith.constant 0 : index
    %1 = vector.load %arg2[%c0_1, %c0_2, %c0_3] : memref<1x1x32xf32, #tpu.memory_space<vmem>>, vector<1x1x32xf32>
    %2 = vector.shape_cast %1 : vector<1x1x32xf32> to vector<1x32xf32>
    %c0_4 = arith.constant 0 : index
    %c0_5 = arith.constant 0 : index
    %c0_6 = arith.constant 0 : index
    %3 = vector.load %arg3[%c0_4, %c0_5, %c0_6] : memref<1x1x32xf32, #tpu.memory_space<vmem>>, vector<1x1x32xf32>
    %4 = vector.shape_cast %3 : vector<1x1x32xf32> to vector<1x32xf32>
    %cst = arith.constant dense<0.000000e+00> : vector<8xf32>
    %5 = vector.multi_reduction <add>, %0, %cst [1] : vector<8x32xf32> to vector<8xf32>
    %6 = vector.shape_cast %5 : vector<8xf32> to vector<8x1xf32>
    %cst_7 = arith.constant 3.200000e+01 : f32
    %7 = vector.broadcast %cst_7 : f32 to vector<8x1xf32>
    %8 = arith.divf %6, %7 : vector<8x1xf32>
    %9 = vector.broadcast %8 : vector<8x1xf32> to vector<8x32xf32>
    %10 = arith.subf %0, %9 : vector<8x32xf32>
    %11 = arith.mulf %10, %10 : vector<8x32xf32>
    %cst_8 = arith.constant dense<0.000000e+00> : vector<8xf32>
    %12 = vector.multi_reduction <add>, %11, %cst_8 [1] : vector<8x32xf32> to vector<8xf32>
    %13 = vector.shape_cast %12 : vector<8xf32> to vector<8x1xf32>
    %cst_9 = arith.constant 3.200000e+01 : f32
    %14 = vector.broadcast %cst_9 : f32 to vector<8x1xf32>
    %15 = arith.divf %13, %14 : vector<8x1xf32>
    %cst_10 = arith.constant 9.99999974E-6 : f32
    %16 = vector.broadcast %cst_10 : f32 to vector<8x1xf32>
    %17 = arith.addf %15, %16 : vector<8x1xf32>
    %18 = math.rsqrt %17 : vector<8x1xf32>
    %19 = vector.broadcast %18 : vector<8x1xf32> to vector<8x32xf32>
    %20 = arith.mulf %10, %19 : vector<8x32xf32>
    %21 = vector.broadcast %2 : vector<1x32xf32> to vector<8x32xf32>
    %22 = arith.mulf %20, %21 : vector<8x32xf32>
    %23 = vector.broadcast %4 : vector<1x32xf32> to vector<8x32xf32>
    %24 = arith.addf %22, %23 : vector<8x32xf32>
    %25 = arith.truncf %24 : vector<8x32xf32> to vector<8x32xbf16>
    %c0_11 = arith.constant 0 : index
    %c0_12 = arith.constant 0 : index
    %c0_13 = arith.constant 0 : index
    %26 = vector.load %arg4[%c0_11, %c0_12, %c0_13] : memref<1x32x32xbf16, #tpu.memory_space<vmem>>, vector<1x32x32xbf16>
    %27 = vector.shape_cast %26 : vector<1x32x32xbf16> to vector<32x32xbf16>
    %cst_14 = arith.constant dense<0.000000e+00> : vector<8x32xf32>
    %28 = tpu.matmul %25, %27, %cst_14 {dimension_numbers = #tpu.dot_dimension_numbers<[1], [0], [0], [1], [0, 0, 1, 1], [], []>} : vector<8x32xbf16>, vector<32x32xbf16>, vector<8x32xf32> -> vector<8x32xf32>
    %c0_15 = arith.constant 0 : index
    %c0_16 = arith.constant 0 : index
    %c0_17 = arith.constant 0 : index
    %29 = vector.load %arg5[%c0_15, %c0_16, %c0_17] : memref<1x32x32xbf16, #tpu.memory_space<vmem>>, vector<1x32x32xbf16>
    %30 = vector.shape_cast %29 : vector<1x32x32xbf16> to vector<32x32xbf16>
    %cst_18 = arith.constant dense<0.000000e+00> : vector<8x32xf32>
    %31 = tpu.matmul %25, %30, %cst_18 {dimension_numbers = #tpu.dot_dimension_numbers<[1], [0], [0], [1], [0, 0, 1, 1], [], []>} : vector<8x32xbf16>, vector<32x32xbf16>, vector<8x32xf32> -> vector<8x32xf32>
    %c0_19 = arith.constant 0 : index
    %c0_20 = arith.constant 0 : index
    %c0_21 = arith.constant 0 : index
    %32 = vector.load %arg6[%c0_19, %c0_20, %c0_21] : memref<1x32x32xbf16, #tpu.memory_space<vmem>>, vector<1x32x32xbf16>
    %33 = vector.shape_cast %32 : vector<1x32x32xbf16> to vector<32x32xbf16>
    %cst_22 = arith.constant dense<0.000000e+00> : vector<8x32xf32>
    %34 = tpu.matmul %25, %33, %cst_22 {dimension_numbers = #tpu.dot_dimension_numbers<[1], [0], [0], [1], [0, 0, 1, 1], [], []>} : vector<8x32xbf16>, vector<32x32xbf16>, vector<8x32xf32> -> vector<8x32xf32>
    %35 = arith.truncf %28 : vector<8x32xf32> to vector<8x32xbf16>
    %36 = vector.extract_strided_slice %35 {offsets = [0, 0], sizes = [8, 8], strides = [1, 1]} : vector<8x32xbf16> to vector<8x8xbf16>
    %37 = vector.shape_cast %36 : vector<8x8xbf16> to vector<1x8x8xbf16>
    %38 = vector.extract_strided_slice %35 {offsets = [0, 8], sizes = [8, 8], strides = [1, 1]} : vector<8x32xbf16> to vector<8x8xbf16>
    %39 = vector.shape_cast %38 : vector<8x8xbf16> to vector<1x8x8xbf16>
    %40 = vector.extract_strided_slice %35 {offsets = [0, 16], sizes = [8, 8], strides = [1, 1]} : vector<8x32xbf16> to vector<8x8xbf16>
    %41 = vector.shape_cast %40 : vector<8x8xbf16> to vector<1x8x8xbf16>
    %42 = vector.extract_strided_slice %35 {offsets = [0, 24], sizes = [8, 8], strides = [1, 1]} : vector<8x32xbf16> to vector<8x8xbf16>
    %43 = vector.shape_cast %42 : vector<8x8xbf16> to vector<1x8x8xbf16>
    %44 = tpu.concatenate %37, %39, %41, %43 in 0 : vector<1x8x8xbf16>, vector<1x8x8xbf16>, vector<1x8x8xbf16>, vector<1x8x8xbf16> -> vector<4x8x8xbf16>
    %45 = arith.truncf %31 : vector<8x32xf32> to vector<8x32xbf16>
    %46 = vector.extract_strided_slice %45 {offsets = [0, 0], sizes = [8, 8], strides = [1, 1]} : vector<8x32xbf16> to vector<8x8xbf16>
    %47 = vector.shape_cast %46 : vector<8x8xbf16> to vector<1x8x8xbf16>
    %48 = vector.extract_strided_slice %45 {offsets = [0, 8], sizes = [8, 8], strides = [1, 1]} : vector<8x32xbf16> to vector<8x8xbf16>
    %49 = vector.shape_cast %48 : vector<8x8xbf16> to vector<1x8x8xbf16>
    %50 = vector.extract_strided_slice %45 {offsets = [0, 16], sizes = [8, 8], strides = [1, 1]} : vector<8x32xbf16> to vector<8x8xbf16>
    %51 = vector.shape_cast %50 : vector<8x8xbf16> to vector<1x8x8xbf16>
    %52 = vector.extract_strided_slice %45 {offsets = [0, 24], sizes = [8, 8], strides = [1, 1]} : vector<8x32xbf16> to vector<8x8xbf16>
    %53 = vector.shape_cast %52 : vector<8x8xbf16> to vector<1x8x8xbf16>
    %54 = tpu.concatenate %47, %49, %51, %53 in 0 : vector<1x8x8xbf16>, vector<1x8x8xbf16>, vector<1x8x8xbf16>, vector<1x8x8xbf16> -> vector<4x8x8xbf16>
    %55 = arith.truncf %34 : vector<8x32xf32> to vector<8x32xbf16>
    %56 = vector.extract_strided_slice %55 {offsets = [0, 0], sizes = [8, 8], strides = [1, 1]} : vector<8x32xbf16> to vector<8x8xbf16>
    %57 = vector.shape_cast %56 : vector<8x8xbf16> to vector<1x8x8xbf16>
    %58 = vector.extract_strided_slice %55 {offsets = [0, 8], sizes = [8, 8], strides = [1, 1]} : vector<8x32xbf16> to vector<8x8xbf16>
    %59 = vector.shape_cast %58 : vector<8x8xbf16> to vector<1x8x8xbf16>
    %60 = vector.extract_strided_slice %55 {offsets = [0, 16], sizes = [8, 8], strides = [1, 1]} : vector<8x32xbf16> to vector<8x8xbf16>
    %61 = vector.shape_cast %60 : vector<8x8xbf16> to vector<1x8x8xbf16>
    %62 = vector.extract_strided_slice %55 {offsets = [0, 24], sizes = [8, 8], strides = [1, 1]} : vector<8x32xbf16> to vector<8x8xbf16>
    %63 = vector.shape_cast %62 : vector<8x8xbf16> to vector<1x8x8xbf16>
    %64 = tpu.concatenate %57, %59, %61, %63 in 0 : vector<1x8x8xbf16>, vector<1x8x8xbf16>, vector<1x8x8xbf16>, vector<1x8x8xbf16> -> vector<4x8x8xbf16>
    "tpu.trace_start"() <{level = 10 : i32, message = "bqd,bkd->bqk"}> : () -> ()
    %cst_23 = arith.constant dense<0.000000e+00> : vector<4x8x8xf32>
    %65 = tpu.matmul %44, %54, %cst_23 {dimension_numbers = #tpu.dot_dimension_numbers<[2], [2], [1], [1], [0, 0, 0, 1, 1, 1], [0], [0]>} : vector<4x8x8xbf16>, vector<4x8x8xbf16>, vector<4x8x8xf32> -> vector<4x8x8xf32>
    "tpu.trace_stop"() : () -> ()
    %cst_24 = arith.constant dense<0xFF800000> : vector<4x8xf32>
    %66 = vector.multi_reduction <maximumf>, %65, %cst_24 [2] : vector<4x8x8xf32> to vector<4x8xf32>
    %67 = vector.shape_cast %66 : vector<4x8xf32> to vector<4x8x1xf32>
    %68 = vector.broadcast %67 : vector<4x8x1xf32> to vector<4x8x8xf32>
    %69 = arith.subf %65, %68 : vector<4x8x8xf32>
    %70 = math.exp %69 : vector<4x8x8xf32>
    %cst_25 = arith.constant dense<0.000000e+00> : vector<4x8xf32>
    %71 = vector.multi_reduction <add>, %70, %cst_25 [2] : vector<4x8x8xf32> to vector<4x8xf32>
    %72 = vector.shape_cast %71 : vector<4x8xf32> to vector<4x8x1xf32>
    %73 = tpu.reciprocal %72 {approx = true} : vector<4x8x1xf32> -> vector<4x8x1xf32>
    %74 = vector.broadcast %73 : vector<4x8x1xf32> to vector<4x8x8xf32>
    %75 = arith.mulf %70, %74 : vector<4x8x8xf32>
    %76 = arith.truncf %75 : vector<4x8x8xf32> to vector<4x8x8xbf16>
    "tpu.trace_start"() <{level = 10 : i32, message = "bqk,bkd->bqd"}> : () -> ()
    %cst_26 = arith.constant dense<0.000000e+00> : vector<4x8x8xf32>
    %77 = tpu.matmul %76, %64, %cst_26 {dimension_numbers = #tpu.dot_dimension_numbers<[2], [1], [1], [2], [0, 0, 0, 1, 1, 2], [0], [0]>} : vector<4x8x8xbf16>, vector<4x8x8xbf16>, vector<4x8x8xf32> -> vector<4x8x8xf32>
    "tpu.trace_stop"() : () -> ()
    %78 = arith.truncf %77 : vector<4x8x8xf32> to vector<4x8x8xbf16>
    %79 = vector.extract_strided_slice %78 {offsets = [0, 0, 0], sizes = [1, 8, 8], strides = [1, 1, 1]} : vector<4x8x8xbf16> to vector<1x8x8xbf16>
    %80 = vector.shape_cast %79 : vector<1x8x8xbf16> to vector<8x8xbf16>
    %81 = vector.extract_strided_slice %78 {offsets = [1, 0, 0], sizes = [1, 8, 8], strides = [1, 1, 1]} : vector<4x8x8xbf16> to vector<1x8x8xbf16>
    %82 = vector.shape_cast %81 : vector<1x8x8xbf16> to vector<8x8xbf16>
    %83 = vector.extract_strided_slice %78 {offsets = [2, 0, 0], sizes = [1, 8, 8], strides = [1, 1, 1]} : vector<4x8x8xbf16> to vector<1x8x8xbf16>
    %84 = vector.shape_cast %83 : vector<1x8x8xbf16> to vector<8x8xbf16>
    %85 = vector.extract_strided_slice %78 {offsets = [3, 0, 0], sizes = [1, 8, 8], strides = [1, 1, 1]} : vector<4x8x8xbf16> to vector<1x8x8xbf16>
    %86 = vector.shape_cast %85 : vector<1x8x8xbf16> to vector<8x8xbf16>
    %87 = tpu.concatenate %80, %82, %84, %86 in 1 : vector<8x8xbf16>, vector<8x8xbf16>, vector<8x8xbf16>, vector<8x8xbf16> -> vector<8x32xbf16>
    %c0_27 = arith.constant 0 : index
    %c0_28 = arith.constant 0 : index
    %c0_29 = arith.constant 0 : index
    %88 = vector.load %arg7[%c0_27, %c0_28, %c0_29] : memref<1x32x32xbf16, #tpu.memory_space<vmem>>, vector<1x32x32xbf16>
    %89 = vector.shape_cast %88 : vector<1x32x32xbf16> to vector<32x32xbf16>
    %cst_30 = arith.constant dense<0.000000e+00> : vector<8x32xf32>
    %90 = tpu.matmul %87, %89, %cst_30 {dimension_numbers = #tpu.dot_dimension_numbers<[1], [0], [0], [1], [0, 0, 1, 1], [], []>} : vector<8x32xbf16>, vector<32x32xbf16>, vector<8x32xf32> -> vector<8x32xf32>
    %91 = arith.addf %0, %90 : vector<8x32xf32>
    %c0_31 = arith.constant 0 : index
    %c0_32 = arith.constant 0 : index
    %c0_33 = arith.constant 0 : index
    %92 = vector.load %arg8[%c0_31, %c0_32, %c0_33] : memref<1x1x32xf32, #tpu.memory_space<vmem>>, vector<1x1x32xf32>
    %93 = vector.shape_cast %92 : vector<1x1x32xf32> to vector<1x32xf32>
    %94 = vector.broadcast %93 : vector<1x32xf32> to vector<8x32xf32>
    %95 = arith.addf %91, %94 : vector<8x32xf32>
    %c0_34 = arith.constant 0 : index
    %c0_35 = arith.constant 0 : index
    %c0_36 = arith.constant 0 : index
    %96 = vector.load %arg9[%c0_34, %c0_35, %c0_36] : memref<1x1x32xf32, #tpu.memory_space<vmem>>, vector<1x1x32xf32>
    %97 = vector.shape_cast %96 : vector<1x1x32xf32> to vector<1x32xf32>
    %c0_37 = arith.constant 0 : index
    %c0_38 = arith.constant 0 : index
    %c0_39 = arith.constant 0 : index
    %98 = vector.load %arg10[%c0_37, %c0_38, %c0_39] : memref<1x1x32xf32, #tpu.memory_space<vmem>>, vector<1x1x32xf32>
    %99 = vector.shape_cast %98 : vector<1x1x32xf32> to vector<1x32xf32>
    %cst_40 = arith.constant dense<0.000000e+00> : vector<8xf32>
    %100 = vector.multi_reduction <add>, %95, %cst_40 [1] : vector<8x32xf32> to vector<8xf32>
    %101 = vector.shape_cast %100 : vector<8xf32> to vector<8x1xf32>
    %cst_41 = arith.constant 3.200000e+01 : f32
    %102 = vector.broadcast %cst_41 : f32 to vector<8x1xf32>
    %103 = arith.divf %101, %102 : vector<8x1xf32>
    %104 = vector.broadcast %103 : vector<8x1xf32> to vector<8x32xf32>
    %105 = arith.subf %95, %104 : vector<8x32xf32>
    %106 = arith.mulf %105, %105 : vector<8x32xf32>
    %cst_42 = arith.constant dense<0.000000e+00> : vector<8xf32>
    %107 = vector.multi_reduction <add>, %106, %cst_42 [1] : vector<8x32xf32> to vector<8xf32>
    %108 = vector.shape_cast %107 : vector<8xf32> to vector<8x1xf32>
    %cst_43 = arith.constant 3.200000e+01 : f32
    %109 = vector.broadcast %cst_43 : f32 to vector<8x1xf32>
    %110 = arith.divf %108, %109 : vector<8x1xf32>
    %cst_44 = arith.constant 9.99999974E-6 : f32
    %111 = vector.broadcast %cst_44 : f32 to vector<8x1xf32>
    %112 = arith.addf %110, %111 : vector<8x1xf32>
    %113 = math.rsqrt %112 : vector<8x1xf32>
    %114 = vector.broadcast %113 : vector<8x1xf32> to vector<8x32xf32>
    %115 = arith.mulf %105, %114 : vector<8x32xf32>
    %116 = vector.broadcast %97 : vector<1x32xf32> to vector<8x32xf32>
    %117 = arith.mulf %115, %116 : vector<8x32xf32>
    %118 = vector.broadcast %99 : vector<1x32xf32> to vector<8x32xf32>
    %119 = arith.addf %117, %118 : vector<8x32xf32>
    %120 = arith.truncf %119 : vector<8x32xf32> to vector<8x32xbf16>
    %c0_45 = arith.constant 0 : index
    %c0_46 = arith.constant 0 : index
    %c0_47 = arith.constant 0 : index
    %121 = vector.load %arg11[%c0_45, %c0_46, %c0_47] : memref<1x32x128xbf16, #tpu.memory_space<vmem>>, vector<1x32x128xbf16>
    %122 = vector.shape_cast %121 : vector<1x32x128xbf16> to vector<32x128xbf16>
    %cst_48 = arith.constant dense<0.000000e+00> : vector<8x128xf32>
    %123 = tpu.matmul %120, %122, %cst_48 {dimension_numbers = #tpu.dot_dimension_numbers<[1], [0], [0], [1], [0, 0, 1, 1], [], []>} : vector<8x32xbf16>, vector<32x128xbf16>, vector<8x128xf32> -> vector<8x128xf32>
    %c0_49 = arith.constant 0 : index
    %c0_50 = arith.constant 0 : index
    %c0_51 = arith.constant 0 : index
    %124 = vector.load %arg12[%c0_49, %c0_50, %c0_51] : memref<1x1x128xf32, #tpu.memory_space<vmem>>, vector<1x1x128xf32>
    %125 = vector.shape_cast %124 : vector<1x1x128xf32> to vector<1x128xf32>
    %126 = vector.broadcast %125 : vector<1x128xf32> to vector<8x128xf32>
    %127 = arith.addf %123, %126 : vector<8x128xf32>
    %128 = arith.mulf %127, %127 : vector<8x128xf32>
    %129 = arith.mulf %127, %128 : vector<8x128xf32>
    %cst_52 = arith.constant 4.471500e-02 : f32
    %130 = vector.broadcast %cst_52 : f32 to vector<8x128xf32>
    %131 = arith.mulf %130, %129 : vector<8x128xf32>
    %132 = arith.addf %127, %131 : vector<8x128xf32>
    %cst_53 = arith.constant 0.797884583 : f32
    %133 = vector.broadcast %cst_53 : f32 to vector<8x128xf32>
    %134 = arith.mulf %133, %132 : vector<8x128xf32>
    %135 = math.tanh %134 : vector<8x128xf32>
    %cst_54 = arith.constant 1.000000e+00 : f32
    %136 = vector.broadcast %cst_54 : f32 to vector<8x128xf32>
    %137 = arith.addf %136, %135 : vector<8x128xf32>
    %cst_55 = arith.constant 5.000000e-01 : f32
    %138 = vector.broadcast %cst_55 : f32 to vector<8x128xf32>
    %139 = arith.mulf %138, %137 : vector<8x128xf32>
    %140 = arith.mulf %127, %139 : vector<8x128xf32>
    %141 = arith.truncf %140 : vector<8x128xf32> to vector<8x128xbf16>
    %c0_56 = arith.constant 0 : index
    %c0_57 = arith.constant 0 : index
    %c0_58 = arith.constant 0 : index
    %142 = vector.load %arg13[%c0_56, %c0_57, %c0_58] : memref<1x128x32xbf16, #tpu.memory_space<vmem>>, vector<1x128x32xbf16>
    %143 = vector.shape_cast %142 : vector<1x128x32xbf16> to vector<128x32xbf16>
    %cst_59 = arith.constant dense<0.000000e+00> : vector<8x32xf32>
    %144 = tpu.matmul %141, %143, %cst_59 {dimension_numbers = #tpu.dot_dimension_numbers<[1], [0], [0], [1], [0, 0, 1, 1], [], []>} : vector<8x128xbf16>, vector<128x32xbf16>, vector<8x32xf32> -> vector<8x32xf32>
    %c0_60 = arith.constant 0 : index
    %c0_61 = arith.constant 0 : index
    %c0_62 = arith.constant 0 : index
    %145 = vector.load %arg14[%c0_60, %c0_61, %c0_62] : memref<1x1x32xf32, #tpu.memory_space<vmem>>, vector<1x1x32xf32>
    %146 = vector.shape_cast %145 : vector<1x1x32xf32> to vector<1x32xf32>
    %147 = vector.broadcast %146 : vector<1x32xf32> to vector<8x32xf32>
    %148 = arith.addf %144, %147 : vector<8x32xf32>
    %149 = arith.addf %95, %148 : vector<8x32xf32>
    %c0_63 = arith.constant 0 : index
    %c0_64 = arith.constant 0 : index
    %150 = vector.load %arg15[%c0_63, %c0_64] : memref<8x32xf32, #tpu.memory_space<vmem>>, vector<8x32xf32>
    tpu.vector_store %arg15[%c0_63, %c0_64], %149 {strides = array<i32>} : memref<8x32xf32, #tpu.memory_space<vmem>>, vector<8x32xf32>,
    return
  }
  func.func @transform_0(%arg0: i32) -> (i32, i32) {
    %c0_i32 = arith.constant 0 : i32
    %c0_i32_0 = arith.constant 0 : i32
    return %arg0, %c0_i32 : i32, i32
  }
  func.func @transform_1(%arg0: i32) -> (i32, i32, i32) {
    %c0_i32 = arith.constant 0 : i32
    %c0_i32_0 = arith.constant 0 : i32
    %c0_i32_1 = arith.constant 0 : i32
    %c0_i32_2 = arith.constant 0 : i32
    return %c0_i32, %c0_i32_0, %c0_i32_1 : i32, i32, i32
  }
  func.func @transform_2(%arg0: i32) -> (i32, i32, i32) {
    %c0_i32 = arith.constant 0 : i32
    %c0_i32_0 = arith.constant 0 : i32
    %c0_i32_1 = arith.constant 0 : i32
    %c0_i32_2 = arith.constant 0 : i32
    return %c0_i32, %c0_i32_0, %c0_i32_1 : i32, i32, i32
  }
  func.func @transform_3(%arg0: i32) -> (i32, i32, i32) {
    %c0_i32 = arith.constant 0 : i32
    %c0_i32_0 = arith.constant 0 : i32
    %c0_i32_1 = arith.constant 0 : i32
    %c0_i32_2 = arith.constant 0 : i32
    return %c0_i32, %c0_i32_0, %c0_i32_1 : i32, i32, i32
  }
  func.func @transform_4(%arg0: i32) -> (i32, i32, i32) {
    %c0_i32 = arith.constant 0 : i32
    %c0_i32_0 = arith.constant 0 : i32
    %c0_i32_1 = arith.constant 0 : i32
    %c0_i32_2 = arith.constant 0 : i32
    return %c0_i32, %c0_i32_0, %c0_i32_1 : i32, i32, i32
  }
  func.func @transform_5(%arg0: i32) -> (i32, i32, i32) {
    %c0_i32 = arith.constant 0 : i32
    %c0_i32_0 = arith.constant 0 : i32
    %c0_i32_1 = arith.constant 0 : i32
    %c0_i32_2 = arith.constant 0 : i32
    return %c0_i32, %c0_i32_0, %c0_i32_1 : i32, i32, i32
  }
  func.func @transform_6(%arg0: i32) -> (i32, i32, i32) {
    %c0_i32 = arith.constant 0 : i32
    %c0_i32_0 = arith.constant 0 : i32
    %c0_i32_1 = arith.constant 0 : i32
    %c0_i32_2 = arith.constant 0 : i32
    return %c0_i32, %c0_i32_0, %c0_i32_1 : i32, i32, i32
  }
  func.func @transform_7(%arg0: i32) -> (i32, i32, i32) {
    %c0_i32 = arith.constant 0 : i32
    %c0_i32_0 = arith.constant 0 : i32
    %c0_i32_1 = arith.constant 0 : i32
    %c0_i32_2 = arith.constant 0 : i32
    return %c0_i32, %c0_i32_0, %c0_i32_1 : i32, i32, i32
  }
  func.func @transform_8(%arg0: i32) -> (i32, i32, i32) {
    %c0_i32 = arith.constant 0 : i32
    %c0_i32_0 = arith.constant 0 : i32
    %c0_i32_1 = arith.constant 0 : i32
    %c0_i32_2 = arith.constant 0 : i32
    return %c0_i32, %c0_i32_0, %c0_i32_1 : i32, i32, i32
  }
  func.func @transform_9(%arg0: i32) -> (i32, i32, i32) {
    %c0_i32 = arith.constant 0 : i32
    %c0_i32_0 = arith.constant 0 : i32
    %c0_i32_1 = arith.constant 0 : i32
    %c0_i32_2 = arith.constant 0 : i32
    return %c0_i32, %c0_i32_0, %c0_i32_1 : i32, i32, i32
  }
  func.func @transform_10(%arg0: i32) -> (i32, i32, i32) {
    %c0_i32 = arith.constant 0 : i32
    %c0_i32_0 = arith.constant 0 : i32
    %c0_i32_1 = arith.constant 0 : i32
    %c0_i32_2 = arith.constant 0 : i32
    return %c0_i32, %c0_i32_0, %c0_i32_1 : i32, i32, i32
  }
  func.func @transform_11(%arg0: i32) -> (i32, i32, i32) {
    %c0_i32 = arith.constant 0 : i32
    %c0_i32_0 = arith.constant 0 : i32
    %c0_i32_1 = arith.constant 0 : i32
    %c0_i32_2 = arith.constant 0 : i32
    return %c0_i32, %c0_i32_0, %c0_i32_1 : i32, i32, i32
  }
  func.func @transform_12(%arg0: i32) -> (i32, i32, i32) {
    %c0_i32 = arith.constant 0 : i32
    %c0_i32_0 = arith.constant 0 : i32
    %c0_i32_1 = arith.constant 0 : i32
    %c0_i32_2 = arith.constant 0 : i32
    return %c0_i32, %c0_i32_0, %c0_i32_1 : i32, i32, i32
  }
  func.func @transform_13(%arg0: i32) -> (i32, i32, i32) {
    %c0_i32 = arith.constant 0 : i32
    %c0_i32_0 = arith.constant 0 : i32
    %c0_i32_1 = arith.constant 0 : i32
    %c0_i32_2 = arith.constant 0 : i32
    return %c0_i32, %c0_i32_0, %c0_i32_1 : i32, i32, i32
  }
  func.func @transform_14(%arg0: i32) -> (i32, i32) {
    %c0_i32 = arith.constant 0 : i32
    %c0_i32_0 = arith.constant 0 : i32
    return %arg0, %c0_i32 : i32, i32
  }
}

</mosaic_0001>

<bundles_post_ra>
// kernel: tpu_custom_call.1
= control target key start
LH: loop header
LB: loop body
LE: loop exit
PB: predicated region body
PF: predicated region fallthrough
CT: control target
= control target key end

     0   :  { %s2502_s0 = inlined_call_operand.vmem [shape: f32[16,32], index: 0, kind: input, shape index: {}]   ;;  %s2503_s1 = inlined_call_operand.vmem [shape: f32[1,1,32], index: 1, kind: input, shape index: {}]   ;;  %s2504_s2 = inlined_call_operand.vmem [shape: f32[1,1,32], index: 2, kind: input, shape index: {}]   ;;  %s2505_s3 = inlined_call_operand.vmem [shape: bf16[1,32,32], index: 3, kind: input, shape index: {}]   ;;  %s2506_s4 = inlined_call_operand.vmem [shape: bf16[1,32,32], index: 4, kind: input, shape index: {}]   ;;  %s2507_s5 = inlined_call_operand.vmem [shape: bf16[1,32,32], index: 5, kind: input, shape index: {}]   ;;  %s2508_s6 = inlined_call_operand.vmem [shape: bf16[1,32,32], index: 6, kind: input, shape index: {}]   ;;  %s2509_s7 = inlined_call_operand.hbm [shape: f32[1,1,32], index: 7, kind: input, shape index: {}]   ;;  %s2510_s8 = inlined_call_operand.hbm [shape: f32[1,1,32], index: 8, kind: input, shape index: {}]   ;;  %s2511_s9 = inlined_call_operand.hbm [shape: f32[1,1,32], index: 9, kind: input, shape index: {}]   ;;  %s2512_s10 = inlined_call_operand.vmem [shape: bf16[1,32,128], index: 10, kind: input, shape index: {}]   ;;  %s2513_s11 = inlined_call_operand.vmem [shape: f32[1,1,128], index: 11, kind: input, shape index: {}]   ;;  %s2514_s12 = inlined_call_operand.vmem [shape: bf16[1,128,32], index: 12, kind: input, shape index: {}]   ;;  %s2515_s13 = inlined_call_operand.vmem [shape: f32[1,1,32], index: 13, kind: input, shape index: {}]   ;;  %s2516_s14 = inlined_call_operand.hbm [shape: f32[16,32], index: 14, kind: output, shape index: {}]  }
   0x1   :  { %2529 = sst [smem:[#allocation19_spill]] %s2516_s14 }
   0x2   :  { %19 = vsyncpa [#allocation3], 0 }
   0x3   :  { %20 = vsyncpa [#allocation6], 0 }
   0x4   :  { %21 = vsyncpa [#allocation4], 0 }
   0x5   :  { %23 = vsyncpa [#allocation4 + $0x1], 0  ;;  %s2123_s29 = smov 0   ;;  %s2125_s30 = smov 0  }
   0x6   :  { %s2127_s15 = smov 0   ;;  %s2129_s16 = smov 0  }
   0x7 LB: > { %2530 = sst [smem:[#allocation12_spill]] %s2022_s29  ;;  %s2144_s17 = sadd.s32 4294967295, %s2034_s16   ;;  %s2034_s16 = sphi %s2129_s16, %s2554_s16   ;;  %s2030_s15 = sphi %s2127_s15, %s2559_s15   ;;  %s2026_s30 = sphi %s2125_s30, %s2558_s30   ;;  %s2022_s29 = sphi %s2123_s29, %s2557_s29  }
   0x8   : > { %2531 = sst [smem:[#allocation13_spill]] %s2030_s15  ;;  %s1560_s18 = sadd.s32 4294967294, %s2034_s16  }
   0x9   : > { %2532 = sst [smem:[#allocation14_spill]] %s2034_s16  ;;  %s2148_s19 = sadd.s32 1, %s2034_s16  }
   0xa   : > { %2533 = sst [smem:[#allocation15_spill]] %s2148_s19  ;;  %s335_s20 = sadd.s32 1, %s2030_s15 }
   0xb   : > { %s332_s21 = ssub.s32 %s2034_s16, %s2148_s19  ;;  %p345_p0 = scmp.ne.s32.totalorder %s2030_s15, %s2026_s30 }
   0xc   : > { %p333_p1 = scmp.eq.s32.totalorder %s332_s21, 0  ;;  %p346_p2 = scmp.eq.s32.totalorder %s2144_s17, 1 }
   0xd   : > { %p351_p3 = scmp.ne.s32.totalorder %s2026_s30, %s2022_s29  ;;  %p352_p4 = scmp.eq.s32.totalorder %s1560_s18, 1 }
   0xe   : > { %s2159_s22 = scalar_select %p333_p1, %s2030_s15, %s335_s20  }
   0xf   : > { %p2161_p5 = por %p346_p2, %p345_p0  ;;  %p2165_p6 = por %p352_p4, %p351_p3 }
  0x10   : > { %2534 = sst [smem:[#allocation16_spill]] %s2159_s22  ;;  %p1561_p7 = scmp.ge.s32.totalorder %s2034_s16, 1 }
  0x11   : > { %s2535_s23 = scalar_select %p2161_p5, 1, 0 }
  0x12   : > { %s2537_s24 = scalar_select %p2165_p6, 1, 0 }
  0x13   : > { %2536 = sst [smem:[#allocation17_spill]] %s2535_s23  ;;  %p359_p8 = scmp.lt.s32.totalorder %s2034_s16, 3 }
  0x14   : > { %2538 = sst [smem:[#allocation18_spill]] %s2537_s24  ;;  %p2523_p9 = scmp.eq.s32.totalorder %s2144_s17, 0 }
  0x15   : > { %p2172_p10 = pnand %p1561_p7, %p359_p8  ;;  %s2036_s26 = smov [#allocation5]  }
  0x16   : > { %s401_s27 = sshll.u32 %s2036_s26, 4  ;;  %s2037_s28 = smov [#allocation2]   ;;  %s402_s27 = int_to_ptr.vmem [resolvable:$true] %s401_s27 }
  0x17   : > { %s2539_s25 = scalar_select %p2172_p10, 1, 0 }
  0x18   : > { %p1776_p11 = pneg %p2172_p10  ;;  %s390_s18 = sshll.u32 %s2037_s28, 4  ;;  %s2184_s18 = int_to_ptr.vmem [resolvable:$true] %s390_s18 }
  0x19   : > { %s2038_s21 = smov [#allocation7]   ;;  %s1880_s26 = scalar_lea.hbm %s2510_s8, 16 }
  0x1a   : > { %p2180_p12 = pnand %p2523_p9, %p1776_p11  ;;  %s412_s22 = sshll.u32 %s2038_s21, 4  ;;  %s2186_s22 = int_to_ptr.vmem [resolvable:$true] %s412_s22 }
  0x1b   : > { %p1881_p13 = scmp.ne.s32.totalorder %s2510_s8, %s1880_s26  ;;  %p1887_p3 = scmp.lt.u32.totalorder %s1880_s26, %s2510_s8 }
  0x1c   : > { %p2196_p0 = pneg %p2180_p12 }
  0x1e   : > { %p1883_p1 = pnand %p2196_p0, %p1881_p13 }
  0x20   : > { %p1884_p2 = pneg %p1883_p1 }
  0x22   : > { %p1889_p4 = pnand %p1887_p3, %p1884_p2 }
  0x24   : > { %1892 = shalt.err (!%p1889_p4)
}
  0x25   : > { %s1893_s15 = scalar_lea.vmem %s402_s27, 16  ;;  %s1900_s29 = scalar_lea.vmem %s402_s27, 32 }
  0x26   : > { %p1894_p7 = scmp.ne.s32.totalorder %s402_s27, %s1893_s15  ;;  %p1901_p9 = scmp.lt.s32.totalorder %s402_s27, %s402_s27 }
  0x27   : > { %p1902_p6 = scmp.lt.s32.totalorder %s1900_s29, %s1893_s15 }
  0x28   : > { %p1896_p8 = pnand %p1894_p7, %p2196_p0 }
  0x29   : > { %p1903_p5 = por %p1902_p6, %p1901_p9 }
  0x2a   : > { %p1897_p11 = pneg %p1896_p8 }
  0x2c   : > { %p1904_p10 = pnand %p1903_p5, %p1897_p11 }
  0x2e   : > { %1907 = shalt.err (!%p1904_p10)
}
  0x2f   : > { %1782 = dma.hbm_to_vmem [thread:$0]  (!%p2180_p12), %s2510_s8, 16, %s402_s27, [#allocation6]  }
  0x30   : > { %s1908_s21 = scalar_lea.hbm %s2509_s7, 16 }
  0x31   : > { %p1909_p13 = scmp.ne.s32.totalorder %s2509_s7, %s1908_s21  ;;  %p1915_p5 = scmp.lt.u32.totalorder %s1908_s21, %s2509_s7 }
  0x33   : > { %p1911_p1 = pnand %p1909_p13, %p2196_p0 }
  0x35   : > { %p1912_p6 = pneg %p1911_p1 }
  0x37   : > { %p1917_p9 = pnand %p1915_p5, %p1912_p6 }
  0x39   : > { %1920 = shalt.err (!%p1917_p9)
}
  0x3a   : > { %s1921_s27 = scalar_lea.vmem %s2184_s18, 16  ;;  %s1928_s14 = scalar_lea.vmem %s2184_s18, 32 }
  0x3b   : > { %p1922_p10 = scmp.ne.s32.totalorder %s2184_s18, %s1921_s27  ;;  %p1929_p4 = scmp.lt.s32.totalorder %s2184_s18, %s2184_s18 }
  0x3c   : > { %p1930_p7 = scmp.lt.s32.totalorder %s1928_s14, %s1921_s27 }
  0x3d   : > { %p1924_p2 = pnand %p1922_p10, %p2196_p0 }
  0x3e   : > { %p1931_p8 = por %p1930_p7, %p1929_p4 }
  0x3f   : > { %p1925_p3 = pneg %p1924_p2 }
  0x41   : > { %p1932_p11 = pnand %p1931_p8, %p1925_p3 }
  0x43   : > { %1935 = shalt.err (!%p1932_p11)
}
  0x44   : > { %1779 = dma.hbm_to_vmem [thread:$0]  (!%p2180_p12), %s2509_s7, 16, %s2184_s18, [#allocation3]  }
  0x45   : > { %s1936_s26 = scalar_lea.hbm %s2511_s9, 16 }
  0x46   : > { %p1937_p13 = scmp.ne.s32.totalorder %s2511_s9, %s1936_s26  ;;  %p1943_p5 = scmp.lt.u32.totalorder %s1936_s26, %s2511_s9 }
  0x48   : > { %p1939_p1 = pnand %p1937_p13, %p2196_p0 }
  0x4a   : > { %p1940_p6 = pneg %p1939_p1 }
  0x4c   : > { %p1945_p9 = pnand %p1943_p5, %p1940_p6 }
  0x4e   : > { %1948 = shalt.err (!%p1945_p9)
}
  0x4f   : > { %s1949_s18 = scalar_lea.vmem %s2186_s22, 16  ;;  %s1956_s14 = scalar_lea.vmem %s2186_s22, 32 }
  0x50   : > { %p1950_p10 = scmp.ne.s32.totalorder %s2186_s22, %s1949_s18  ;;  %p1957_p4 = scmp.lt.s32.totalorder %s2186_s22, %s2186_s22 }
  0x51   : > { %p1958_p7 = scmp.lt.s32.totalorder %s1956_s14, %s1949_s18 }
  0x52   : > { %p1952_p2 = pnand %p1950_p10, %p2196_p0 }
  0x53   : > { %p1959_p8 = por %p1958_p7, %p1957_p4 }
  0x54   : > { %p1953_p3 = pneg %p1952_p2 }
  0x56   : > { %p1960_p11 = pnand %p1959_p8, %p1953_p3 }
  0x58   : > { %1963 = shalt.err (!%p1960_p11)
}
  0x59   : > { %1785 = dma.hbm_to_vmem [thread:$0]  (!%p2180_p12), %s2511_s9, 16, %s2186_s22, [#allocation6]  }
  0x5a   : > { %p2542_p13 = scmp.ne.s32.totalorder %s2539_s25, 0 }
  0x5b   : > { %p2543_p0 = scmp.eq.s32.totalorder (!%p2542_p13), %s2144_s17, 0 }
  0x5c   : > { %444 = sbr.rel (%p2542_p13) target bundleno = 2685 (0xa7d), region = 76 }
  0x63   : > { %2009 = dma.done.wait (%p2543_p0), [#allocation3], 16   ;;  %p2544_p1 = pmov %p2543_p0 }
  0x64   : > { %p2545_p6 = pmov %p2543_p0 }
  0x65   : > { %2011 = vsyncadd (%p2544_p1), [#allocation3], 4294967280 }
  0x66   : > { %2013 = dma.done.wait (%p2545_p6), [#allocation6], 32   ;;  %p2546_p5 = pmov %p2543_p0 }
  0x67   : > { %p497_p9 = scmp.lt.s32.totalorder %s2144_s17, 1  ;;  %vm505_vm0 = vcmask 261120   ;;  %v1840_v7 = vld [vmem:[%s2505_s3] sm:$0xff]   ;;  %v2039_v8 = vmov 0.0   ;;  %vm2040_vm1 = vmmov 0   ;;  %v1841_v9 = vld [vmem:[%s2505_s3 + $0x8] sm:$0xff]  }
  0x68   : > { %2015 = vsyncadd (%p2546_p5), [#allocation6], 4294967264  ;;  %1654 = vmatprep.subr.bf16.mxu0 %v2039_v8  ;;  %1658 = vmatprep.mubr.msk.bf16.mxu0 %vm2040_vm1, %v2039_v8  ;;  %v1572_v14 = vld [vmem:[%s2503_s1] ss:$0 sm:$0xff]  ;;  %v1843_v21 = vld [vmem:[%s2506_s4 + $0x8] sm:$0xff]   ;;  %s2041_s26 = smov 120  }
  0x69   : > { %s498_s20 = scalar_select %p497_p9, %s2144_s17, 1  ;;  %1655 = vmatpush3.bf16.msra.mxu0 %v1840_v7  ;;  %1678 = vmatprep.subr.bf16.mxu1 %v2039_v8  ;;  %v1573_v16 = vld [vmem:[%s2504_s2] ss:$0 sm:$0xff]  ;;  %v1845_v23 = vld [vmem:[%s2507_s5 + $0x8] sm:$0xff]   ;;  %vm730_vm2 = vcmask 64512   ;;  %vm966_vm3 = vcmask 1043456  }
  0x6a   : > { %1656 = vmatprep.subr.bf16.mxu0 %v2039_v8  ;;  %1680 = vmatprep.mubr.msk.bf16.mxu1 %vm2040_vm1, %v2039_v8  ;;  %v1842_v19 = vld [vmem:[%s2506_s4] sm:$0xff]   ;;  %s2042_s21 = smov 112   ;;  %s2043_s15 = smov 104   ;;  %vm1164_vm4 = vcmask 130048   ;;  %vm1167_vm5 = vcmask 195584  }
  0x6b   : > { %s1571_s22 = sshll.u32 %s498_s20, 3  ;;  %v1844_v22 = vld [vmem:[%s2507_s5] sm:$0xff]   ;;  %s2044_s23 = smov 8  }
  0x6c   : > { %s500_s24 = scalar_lea.vmem %s2502_s0, %s1571_s22  ;;  %s2045_s19 = smov 16  }
  0x6d   : > { %v2275_v0 = vld [vmem:[%s500_s24] sm:$0xff]  ;;  %1657 = vmatpush3.bf16.msra.mxu0 %v1841_v9  ;;  %s2046_s20 = smov 24   ;;  %s2547_s14 = sld [smem:[#allocation17_spill]] }
  0x6e   : > { %v506_v1 = vsel %vm505_vm0, %v2275_v0, 0.0  ;;  %1662 = vmatprep.subr.bf16.mxu0 %v2039_v8  ;;  %s2548_s25 = sld [smem:[#allocation19_spill]] }
  0x6f   : > { %507 = vadd.xlane.f32.xlu0 %v506_v1 }
  0x73   : > { %p2549_p10 = scmp.ne.s32.totalorder %s2547_s14, 0 }
  0xfc   : > { %v508_v2 = vpop.xlane.xlu0 %507 }
  0xfd   : > { %v510_v3 = vmul.f32 0.03125, %v508_v2 }
  0xff   : > { %v511_v4 = vsub.f32 %v2275_v0, %v510_v3 }
 0x101   : > { %v512_v5 = vmul.f32 %v511_v4, %v511_v4 }
 0x103   : > { %v513_v6 = vsel %vm505_vm0, %v512_v5, 0.0 }
 0x104   : > { %514 = vadd.xlane.f32.xlu0 %v513_v6 }
 0x191   : > { %v515_v10 = vpop.xlane.xlu0 %514 }
 0x192   : > { %v516_v11 = vmul.f32 0.03125, %v515_v10 }
 0x194   : > { %v517_v12 = vadd.f32 1e-05, %v516_v11 }
 0x196   : > { %1858 = vrsqrt.f32 %v517_v12 }
 0x1a0   : > { %v1859_v13 = vpop.eup %1858 }
 0x1a1   : > { %v519_v15 = vmul.f32 %v1859_v13, %v511_v4 }
 0x1a3   : > { %v526_v17 = vmul.f32 %v1572_v14, %v519_v15 }
 0x1a5   : > { %v533_v18 = vadd.f32 %v1573_v16, %v526_v17 }
 0x1a7   : > { %v534_v20 = vpack.c.bf16 %v533_v18, %v533_v18 }
 0x1a9   : > { %1659 = vmatmul.mubr.msk.bf16.vlgmr.msra.gmra.mrb[0].mxu0 %vm505_vm0, %v534_v20 }
 0x1aa   : > { %1663 = vmatpush3.bf16.msra.mxu0 %v1842_v19  ;;  %1666 = vmatprep.mubr.msk.bf16.mxu0 %vm2040_vm1, %v2039_v8 }
 0x1ab   : > { %1664 = vmatprep.subr.bf16.mxu0 %v2039_v8 }
 0x1ae   : > { %1665 = vmatpush3.bf16.msra.mxu0 %v1843_v21 }
 0x1af   : > { %1670 = vmatprep.subr.bf16.mxu0 %v2039_v8 }
 0x1b1   : > { %1667 = vmatmul.mubr.msk.bf16.vlgmr.msra.gmra.mrb[4].mxu0 %vm505_vm0, %v534_v20 }
 0x1b2   : > { %1671 = vmatpush3.bf16.msra.mxu0 %v1844_v22  ;;  %1674 = vmatprep.mubr.msk.bf16.mxu0 %vm2040_vm1, %v2039_v8 }
 0x1b3   : > { %1672 = vmatprep.subr.bf16.mxu0 %v2039_v8 }
 0x1b6   : > { %1673 = vmatpush3.bf16.msra.mxu0 %v1845_v23 }
 0x1b7   : > { %1684 = vmatprep.subr.bf16.mxu0 %v2039_v8 }
 0x1b9   : > { %1675 = vmatmul.mubr.msk.bf16.vlgmr.msra.gmra.mrb[8].mxu0 %vm505_vm0, %v534_v20 }
 0x1ba   : > { %1686 = vmatprep.mubr.msk.bf16.mxu0 %vm2040_vm1, %v2039_v8 }
 0x27c   : > { %v588_v24 = vpop.f32.mrb[0].mxu0 }
 0x27d   : > { %v706_v25 = vpack.c.bf16 %v588_v24, %v588_v24  ;;  %v1660_v26 = vpop.f32.mrb[1].mxu0 }
 0x27e   : > { %v591_v27 = vpop.f32.mrb[2].mxu0 }
 0x27f   : > { %708 = vrot.lane.b32.xlu0 %v706_v25, %s2041_s26  ;;  %v1661_v28 = vpop.f32.mrb[3].mxu0 }
 0x284   : > { %v644_v29 = vpop.f32.mrb[4].mxu0 }
 0x285   : > { %v714_v30 = vpack.c.bf16 %v644_v29, %v644_v29  ;;  %v1668_v31 = vpop.f32.mrb[5].mxu0 }
 0x286   : > { %v647_v32 = vpop.f32.mrb[6].mxu0 }
 0x287   : > { %716 = vrot.lane.b32.xlu1 %v714_v30, %s2041_s26  ;;  %v1669_v33 = vpop.f32.mrb[7].mxu0  ;;  %v735_v34 = vsel %vm730_vm2, %v714_v30, 0 }
 0x288   : > { %1679 = vmatpush3.bf16.xpose.msra.mxu1 %v735_v34 }
 0x289   : > { %1690 = vmatprep.subr.bf16.mxu1 %v2039_v8 }
 0x28b   : > { %718 = vrot.lane.b32.xlu1 %v714_v30, %s2042_s21 }
 0x28c   : > { %v700_v35 = vpop.f32.mrb[8].mxu0 }
 0x28d   : > { %v1676_v36 = vpop.f32.mrb[9].mxu0  ;;  %v2341_v45 = vpack.c.bf16 %v700_v35, %v700_v35 }
 0x28e   : > { %v703_v37 = vpop.f32.mrb[10].mxu0 }
 0x28f   : > { %720 = vrot.lane.b32.xlu1 %v714_v30, %s2043_s15  ;;  %v1677_v38 = vpop.f32.mrb[11].mxu0  ;;  %1681 = vmatmul.mubr.msk.bf16.vlgmr.msra.gmra.mrb[0].mxu1 %vm730_vm2, %v706_v25  ;;  %v968_v48 = vsel %vm966_vm3, %v2341_v45, 0 }
 0x290   : > { %1692 = vmatprep.mubr.msk.bf16.mxu1 %vm2040_vm1, %v2039_v8 }
 0x293   : > { %710 = vrot.lane.b32.xlu1 %v706_v25, %s2042_s21 }
 0x297   : > { %712 = vrot.lane.b32.xlu1 %v706_v25, %s2043_s15 }
 0x2f1   : > { %v709_v43 = vpop.permute.xlu0 %708 }
 0x2f9   : > { %v717_v39 = vpop.permute.xlu1 %716 }
 0x2fa   : > { %v781_v40 = vsel %vm730_vm2, %v717_v39, 0 }
 0x2fb   : > { %1685 = vmatpush3.bf16.xpose.msra.mxu0 %v781_v40 }
 0x2fc   : > { %1696 = vmatprep.subr.bf16.mxu0 %v2039_v8 }
 0x2fd   : > { %v719_v41 = vpop.permute.xlu1 %718 }
 0x2fe   : > { %v827_v42 = vsel %vm730_vm2, %v719_v41, 0 }
 0x2ff   : > { %1691 = vmatpush3.bf16.xpose.msra.mxu1 %v827_v42 }
 0x300   : > { %1702 = vmatprep.subr.bf16.mxu1 %v2039_v8 }
 0x301   : > { %v721_v44 = vpop.permute.xlu1 %720 }
 0x302   : > { %v873_v46 = vsel %vm730_vm2, %v721_v44, 0  ;;  %1687 = vmatmul.mubr.msk.bf16.vlgmr.msra.gmra.mrb[12].mxu0 %vm730_vm2, %v709_v43 }
 0x303   : > { %1697 = vmatpush3.bf16.xpose.msra.mxu0 %v873_v46  ;;  %1698 = vmatprep.mubr.msk.bf16.mxu0 %vm2040_vm1, %v2039_v8 }
 0x304   : > { %1708 = vmatprep.subr.bf16.mxu0 %v2039_v8 }
 0x305   : > { %v711_v47 = vpop.permute.xlu1 %710 }
 0x306   : > { %1693 = vmatmul.mubr.msk.bf16.vlgmr.msra.gmra.mrb[4].mxu1 %vm730_vm2, %v711_v47 }
 0x307   : > { %1703 = vmatpush3.bf16.msra.mxu1 %v968_v48  ;;  %1704 = vmatprep.mubr.msk.bf16.mxu1 %vm2040_vm1, %v2039_v8 }
 0x308   : > { %1714 = vmatprep.subr.bf16.mxu1 %v2039_v8 }
 0x309   : > { %v713_v49 = vpop.permute.xlu1 %712 }
 0x30a   : > { %1699 = vmatmul.mubr.msk.bf16.vlgmr.msra.gmra.mrb[16].mxu0 %vm730_vm2, %v713_v49 }
 0x30b   : > { %1710 = vmatprep.mubr.msk.bf16.mxu0 %vm2040_vm1, %v2039_v8 }
 0x362   : > { %v771_v50 = vpop.f32.mrb[0].mxu1 }
 0x363   : > { %v1682_v51 = vpop.f32.mrb[1].mxu1  ;;  %v915_v52 = vsel %vm730_vm2, %v771_v50, -inf }
 0x364   : > { %916 = vmax.xlane.f32.xlu1 %v915_v52  ;;  %v774_v53 = vpop.f32.mrb[2].mxu1 }
 0x365   : > { %v1683_v54 = vpop.f32.mrb[3].mxu1 }
 0x366   : > { %v1846_v54 = vld [vmem:[%s2508_s6] sm:$0xff]  }
 0x3d5   : > { %v817_v55 = vpop.f32.mrb[12].mxu0 }
 0x3d6   : > { %v1688_v56 = vpop.f32.mrb[13].mxu0  ;;  %v918_v57 = vsel %vm730_vm2, %v817_v55, -inf }
 0x3d7   : > { %919 = vmax.xlane.f32.xlu0 %v918_v57  ;;  %v820_v58 = vpop.f32.mrb[14].mxu0 }
 0x3d8   : > { %v1689_v59 = vpop.f32.mrb[15].mxu0 }
 0x3d9   : > { %v863_v60 = vpop.f32.mrb[4].mxu1 }
 0x3da   : > { %v1694_v61 = vpop.f32.mrb[5].mxu1  ;;  %v921_v62 = vsel %vm730_vm2, %v863_v60, -inf }
 0x3db   : > { %922 = vmax.xlane.f32.xlu1 %v921_v62  ;;  %v866_v63 = vpop.f32.mrb[6].mxu1 }
 0x3dc   : > { %v1695_v1 = vpop.f32.mrb[7].mxu1 }
 0x3dd   : > { %v909_v2 = vpop.f32.mrb[16].mxu0 }
 0x3de   : > { %v1700_v3 = vpop.f32.mrb[17].mxu0  ;;  %v924_v4 = vsel %vm730_vm2, %v909_v2, -inf }
 0x3df   : > { %925 = vmax.xlane.f32.xlu1 %v924_v4  ;;  %v912_v5 = vpop.f32.mrb[18].mxu0 }
 0x3e0   : > { %v1701_v6 = vpop.f32.mrb[19].mxu0 }
 0x3f1   : > { %v917_v7 = vpop.xlane.xlu1 %916 }
 0x3f2   : > { %v927_v9 = vsub.f32 %v771_v50, %v917_v7 }
 0x3f4   : > { %v931_v10 = vmul.f32 1.442695, %v927_v9 }
 0x3f6   : > { %1860 = vpow2.f32 %v931_v10 }
 0x400   : > { %v1861_v11 = vpop.eup %1860 }
 0x401   : > { %v939_v12 = vsel %vm730_vm2, %v1861_v11, 0.0 }
 0x402   : > { %940 = vadd.xlane.f32.xlu0 %v939_v12 }
 0x464   : > { %v920_v13 = vpop.xlane.xlu0 %919 }
 0x465   : > { %v928_v14 = vsub.f32 %v817_v55, %v920_v13  ;;  %v1847_v55 = vld [vmem:[%s2508_s6 + $0x8] sm:$0xff]  }
 0x467   : > { %v933_v15 = vmul.f32 1.442695, %v928_v14 }
 0x468   : > { %v923_v16 = vpop.xlane.xlu1 %922 }
 0x469   : > { %1862 = vpow2.f32 %v933_v15  ;;  %v929_v17 = vsub.f32 %v863_v60, %v923_v16 }
 0x46b   : > { %v935_v18 = vmul.f32 1.442695, %v929_v17  ;;  %v1594_v17 = vld [vmem:[#allocation2] ss:$0 sm:$0xff] }
 0x46c   : > { %v926_v24 = vpop.xlane.xlu1 %925 }
 0x46d   : > { %1864 = vpow2.f32 %v935_v18  ;;  %v930_v25 = vsub.f32 %v909_v2, %v926_v24 }
 0x46f   : > { %v937_v26 = vmul.f32 1.442695, %v930_v25 }
 0x473   : > { %v1863_v19 = vpop.eup %1862 }
 0x474   : > { %v942_v20 = vsel %vm730_vm2, %v1863_v19, 0.0 }
 0x475   : > { %943 = vadd.xlane.f32.xlu1 %v942_v20 }
 0x477   : > { %v1865_v21 = vpop.eup %1864 }
 0x478   : > { %v945_v22 = vsel %vm730_vm2, %v1865_v21, 0.0 }
 0x479   : > { %946 = vadd.xlane.f32.xlu0 %v945_v22 }
 0x486   : > { %726 = vrot.lane.b32.xlu1 %v2341_v45, %s2042_s21 }
 0x48f   : > { %724 = vrot.lane.b32.xlu0 %v2341_v45, %s2041_s26  ;;  %v941_v23 = vpop.xlane.xlu0 %940  ;;  %s2047_s26 = smov [#allocation8]  }
 0x490   : > { %1866 = vrcp.f32 %v941_v23  ;;  %s1968_s21 = sshll.u32 %s2047_s26, 4  ;;  %s1969_s21 = int_to_ptr.vmem [resolvable:$false] %s1968_s21 }
 0x491   : > { %1868 = vpow2.f32 %v937_v26 }
 0x49a   : > { %v1867_v27 = vpop.eup %1866 }
 0x49b   : > { %v955_v28 = vmul.f32 %v1867_v27, %v1861_v11  ;;  %v1869_v30 = vpop.eup %1868 }
 0x49c   : > { %v948_v31 = vsel %vm730_vm2, %v1869_v30, 0.0 }
 0x49d   : > { %v959_v29 = vpack.c.bf16 %v955_v28, %v955_v28 }
 0x49f   : > { %1705 = vmatmul.mubr.msk.bf16.vlgmr.msra.gmra.mrb[8].mxu1 %vm730_vm2, %v959_v29  ;;  %v1849_v29 = vld [vmem:[%s2512_s10 + $0x8] sm:$0xff]  }
 0x4a0   : > { %1716 = vmatprep.mubr.msk.bf16.mxu1 %vm2040_vm1, %v2039_v8 }
 0x4aa   : > { %949 = vadd.xlane.f32.xlu1 %v948_v31 }
 0x4bb   : > { %728 = vrot.lane.b32.xlu1 %v2341_v45, %s2043_s15  ;;  %s494_s15 = sand.u32 1, %s2026_s30  }
 0x4bc   : > { %s1570_s29 = sshll.u32 %s494_s15, 3 }
 0x502   : > { %v944_v32 = vpop.xlane.xlu1 %943 }
 0x503   : > { %1870 = vrcp.f32 %v944_v32 }
 0x506   : > { %v947_v33 = vpop.xlane.xlu0 %946  ;;  %v727_v34 = vpop.permute.xlu1 %726 }
 0x507   : > { %1872 = vrcp.f32 %v947_v33  ;;  %v1060_v35 = vsel %vm966_vm3, %v727_v34, 0  ;;  %v1595_v34 = vld [vmem:[#allocation5] ss:$0 sm:$0xff] }
 0x508   : > { %1715 = vmatpush3.bf16.msra.mxu1 %v1060_v35 }
 0x509   : > { %1726 = vmatprep.subr.bf16.mxu1 %v2039_v8 }
 0x50a   : > { %v725_v36 = vpop.permute.xlu0 %724 }
 0x50b   : > { %v1014_v37 = vsel %vm966_vm3, %v725_v36, 0  ;;  %v1596_v36 = vld [vmem:[#allocation7] ss:$0 sm:$0xff] }
 0x50c   : > { %1709 = vmatpush3.bf16.msra.mxu0 %v1014_v37 }
 0x50d   : > { %v1871_v38 = vpop.eup %1870  ;;  %1720 = vmatprep.subr.bf16.mxu0 %v2039_v8 }
 0x50e   : > { %v956_v39 = vmul.f32 %v1871_v38, %v1863_v19 }
 0x510   : > { %v960_v40 = vpack.c.bf16 %v956_v39, %v956_v39 }
 0x511   : > { %v1873_v41 = vpop.eup %1872 }
 0x512   : > { %v957_v42 = vmul.f32 %v1873_v41, %v1865_v21  ;;  %1711 = vmatmul.mubr.msk.bf16.vlgmr.msra.gmra.mrb[20].mxu0 %vm730_vm2, %v960_v40  ;;  %v1850_v40 = vld [vmem:[%s2514_s12] sm:$0xff]   ;;  %v1851_v41 = vld [vmem:[%s2514_s12 + $0x8] sm:$0xff]  }
 0x513   : > { %1722 = vmatprep.mubr.msk.bf16.mxu0 %vm2040_vm1, %v2039_v8 }
 0x514   : > { %v961_v43 = vpack.c.bf16 %v957_v42, %v957_v42  ;;  %v1852_v42 = vld [vmem:[%s2514_s12 + $0x10] sm:$0xff]  }
 0x516   : > { %1717 = vmatmul.mubr.msk.bf16.vlgmr.msra.gmra.mrb[12].mxu1 %vm730_vm2, %v961_v43  ;;  %v1853_v43 = vld [vmem:[%s2514_s12 + $0x18] sm:$0xff]  }
 0x517   : > { %1730 = vmatprep.mubr.msk.bf16.mxu1 %vm2040_vm1, %v2039_v8  ;;  %1727 = vmatpush3.bf16.msra.mxu1 %v1846_v54 }
 0x518   : > { %1728 = vmatprep.subr.bf16.mxu1 %v2039_v8 }
 0x51b   : > { %1729 = vmatpush3.bf16.msra.mxu1 %v1847_v55 }
 0x51c   : > { %1742 = vmatprep.subr.bf16.mxu1 %v2039_v8 }
 0x537   : > { %v950_v44 = vpop.xlane.xlu1 %949 }
 0x538   : > { %1874 = vrcp.f32 %v950_v44  ;;  %v1854_v44 = vld [vmem:[%s2514_s12 + $0x20] sm:$0xff]  }
 0x53b   : > { %v729_v45 = vpop.permute.xlu1 %728 }
 0x53c   : > { %v1106_v46 = vsel %vm966_vm3, %v729_v45, 0  ;;  %v1855_v45 = vld [vmem:[%s2514_s12 + $0x28] sm:$0xff]  }
 0x53d   : > { %1721 = vmatpush3.bf16.msra.mxu0 %v1106_v46  ;;  %v1856_v46 = vld [vmem:[%s2514_s12 + $0x30] sm:$0xff]  }
 0x53e   : > { %1734 = vmatprep.subr.bf16.mxu0 %v2039_v8 }
 0x542   : > { %v1875_v47 = vpop.eup %1874 }
 0x543   : > { %v958_v48 = vmul.f32 %v1875_v47, %v1869_v30  ;;  %v1857_v47 = vld [vmem:[%s2514_s12 + $0x38] sm:$0xff]  }
 0x545   : > { %v962_v49 = vpack.c.bf16 %v958_v48, %v958_v48  ;;  %v1597_v48 = vld [vmem:[%s2513_s11] ss:$0 sm:$0xff] }
 0x547   : > { %1723 = vmatmul.mubr.msk.bf16.vlgmr.msra.gmra.mrb[24].mxu0 %vm730_vm2, %v962_v49 }
 0x548   : > { %1738 = vmatprep.mubr.msk.bf16.mxu0 %vm2040_vm1, %v2039_v8 }
 0x572   : > { %v1004_v50 = vpop.f32.mrb[8].mxu1 }
 0x573   : > { %v1706_v51 = vpop.f32.mrb[9].mxu1  ;;  %v1148_v10 = vpack.c.bf16 %v1004_v50, %v1004_v50 }
 0x574   : > { %v1007_v52 = vpop.f32.mrb[10].mxu1 }
 0x575   : > { %v1707_v53 = vpop.f32.mrb[11].mxu1 }
 0x5e5   : > { %v1050_v56 = vpop.f32.mrb[20].mxu0 }
 0x5e6   : > { %v1149_v57 = vpack.c.bf16 %v1050_v56, %v1050_v56  ;;  %v1712_v58 = vpop.f32.mrb[21].mxu0 }
 0x5e7   : > { %v1053_v59 = vpop.f32.mrb[22].mxu0 }
 0x5e8   : > { %1153 = vrot.lane.b32.xlu0 %v1149_v57, %s2044_s23  ;;  %v1713_v60 = vpop.f32.mrb[23].mxu0  ;;  %s1611_s23 = sshll.u32 %s2144_s17, 7  ;;  %s1457_s17 = scalar_lea.sflag [#allocation4], %s494_s15 }
 0x5e9   : > { %v1096_v61 = vpop.f32.mrb[12].mxu1  ;;  %s2459_s24 = scalar_lea.hbm %s2548_s25, %s1611_s23 }
 0x5ea   : > { %v1150_v62 = vpack.c.bf16 %v1096_v61, %v1096_v61  ;;  %v1718_v63 = vpop.f32.mrb[13].mxu1 }
 0x5eb   : > { %v1099_v1 = vpop.f32.mrb[14].mxu1  ;;  %v1601_v63 = vld [vmem:[%s2515_s13] ss:$0 sm:$0xff] }
 0x5ec   : > { %1156 = vrot.lane.b32.xlu1 %v1150_v62, %s2045_s19  ;;  %v1719_v2 = vpop.f32.mrb[15].mxu1  ;;  %s496_s19 = scalar_lea.vmem [#allocation8], %s1570_s29  ;;  %s1970_s29 = scalar_lea.vmem %s1969_s21, 256 }
 0x61a   : > { %v1142_v3 = vpop.f32.mrb[24].mxu0 }
 0x61b   : > { %v1151_v4 = vpack.c.bf16 %v1142_v3, %v1142_v3  ;;  %v1724_v5 = vpop.f32.mrb[25].mxu0 }
 0x61c   : > { %v1145_v6 = vpop.f32.mrb[26].mxu0 }
 0x61d   : > { %1159 = vrot.lane.b32.xlu0 %v1151_v4, %s2046_s20  ;;  %v1725_v7 = vpop.f32.mrb[27].mxu0  ;;  %s1470_s20 = sshll.u32 %s496_s19, 4  ;;  %s2461_s20 = int_to_ptr.vmem [resolvable:$true] %s1470_s20 }
 0x61e   : > { %s1964_s16 = scalar_lea.vmem %s2461_s20, 128  ;;  %p1971_p4 = scmp.lt.s32.totalorder %s2461_s20, %s1969_s21 }
 0x61f   : > { %p1965_p12 = scmp.ne.s32.totalorder %s2461_s20, %s1964_s16  ;;  %p1972_p7 = scmp.lt.s32.totalorder %s1970_s29, %s1964_s16 }
 0x621   : > { %p1966_p2 = pnand %p1965_p12, %p2549_p10  ;;  %p1973_p8 = por %p1972_p7, %p1971_p4 }
 0x623   : > { %p1967_p3 = pneg %p1966_p2 }
 0x625   : > { %p1974_p11 = pnand %p1973_p8, %p1967_p3 }
 0x65a   : > { %v1154_v9 = vpop.permute.xlu0 %1153 }
 0x65b   : > { %v1163_v12 = vsel %vm730_vm2, %v1148_v10, %v1154_v9 }
 0x65e   : > { %v1157_v11 = vpop.permute.xlu1 %1156 }
 0x65f   : > { %v1166_v13 = vsel %vm1164_vm4, %v1163_v12, %v1157_v11 }
 0x68f   : > { %v1160_v14 = vpop.permute.xlu0 %1159 }
 0x690   : > { %v1169_v15 = vsel %vm1167_vm5, %v1166_v13, %v1160_v14 }
 0x691   : > { %1731 = vmatmul.mubr.msk.bf16.vlgmr.msra.gmra.mrb[16].mxu1 %vm505_vm0, %v1169_v15 }
 0x692   : > { %1758 = vmatprep.mubr.msk.bf16.mxu1 %vm2040_vm1, %v2039_v8  ;;  %1743 = vmatpush3.bf16.msra.mxu1 %v1850_v40 }
 0x693   : > { %1744 = vmatprep.subr.bf16.mxu1 %v2039_v8 }
 0x696   : > { %1745 = vmatpush3.bf16.msra.mxu1 %v1851_v41 }
 0x697   : > { %1746 = vmatprep.subr.bf16.mxu1 %v2039_v8 }
 0x69a   : > { %1747 = vmatpush3.bf16.msra.mxu1 %v1852_v42 }
 0x69b   : > { %1748 = vmatprep.subr.bf16.mxu1 %v2039_v8 }
 0x69e   : > { %1749 = vmatpush3.bf16.msra.mxu1 %v1853_v43 }
 0x69f   : > { %1750 = vmatprep.subr.bf16.mxu1 %v2039_v8 }
 0x6a2   : > { %1751 = vmatpush3.bf16.msra.mxu1 %v1854_v44 }
 0x6a3   : > { %1752 = vmatprep.subr.bf16.mxu1 %v2039_v8 }
 0x6a6   : > { %1753 = vmatpush3.bf16.msra.mxu1 %v1855_v45 }
 0x6a7   : > { %1754 = vmatprep.subr.bf16.mxu1 %v2039_v8 }
 0x6aa   : > { %1755 = vmatpush3.bf16.msra.mxu1 %v1856_v46 }
 0x6ab   : > { %1756 = vmatprep.subr.bf16.mxu1 %v2039_v8 }
 0x6ae   : > { %1757 = vmatpush3.bf16.msra.mxu1 %v1857_v47 }
 0x764   : > { %v1222_v16 = vpop.f32.mrb[16].mxu1 }
 0x765   : > { %v1228_v18 = vadd.f32 %v1222_v16, %v2275_v0  ;;  %v1732_v19 = vpop.f32.mrb[17].mxu1  ;;  %v1848_v0 = vld [vmem:[%s2512_s10] sm:$0xff]  }
 0x766   : > { %v1225_v20 = vpop.f32.mrb[18].mxu1  ;;  %1735 = vmatpush3.bf16.msra.mxu0 %v1848_v0 }
 0x767   : > { %v2402_v21 = vadd.f32 %v1594_v17, %v1228_v18  ;;  %v1733_v22 = vpop.f32.mrb[19].mxu1  ;;  %1736 = vmatprep.subr.bf16.mxu0 %v2039_v8 }
 0x769   : > { %v1239_v23 = vsel %vm505_vm0, %v2402_v21, 0.0 }
 0x76a   : > { %1240 = vadd.xlane.f32.xlu1 %v1239_v23  ;;  %1737 = vmatpush3.bf16.msra.mxu0 %v1849_v29 }
 0x7f7   : > { %v1241_v24 = vpop.xlane.xlu1 %1240 }
 0x7f8   : > { %v1242_v25 = vmul.f32 0.03125, %v1241_v24 }
 0x7fa   : > { %v1243_v26 = vsub.f32 %v2402_v21, %v1242_v25 }
 0x7fc   : > { %v1244_v27 = vmul.f32 %v1243_v26, %v1243_v26 }
 0x7fe   : > { %v1245_v28 = vsel %vm505_vm0, %v1244_v27, 0.0 }
 0x7ff   : > { %1246 = vadd.xlane.f32.xlu0 %v1245_v28 }
 0x88c   : > { %v1247_v30 = vpop.xlane.xlu0 %1246 }
 0x88d   : > { %v1248_v31 = vmul.f32 0.03125, %v1247_v30 }
 0x88f   : > { %v1249_v32 = vadd.f32 1e-05, %v1248_v31 }
 0x891   : > { %1876 = vrsqrt.f32 %v1249_v32 }
 0x89b   : > { %v1877_v33 = vpop.eup %1876 }
 0x89c   : > { %v1251_v35 = vmul.f32 %v1877_v33, %v1243_v26 }
 0x89e   : > { %v1258_v37 = vmul.f32 %v1595_v34, %v1251_v35 }
 0x8a0   : > { %v1265_v38 = vadd.f32 %v1596_v36, %v1258_v37 }
 0x8a2   : > { %v1266_v39 = vpack.c.bf16 %v1265_v38, %v1265_v38 }
 0x8a4   : > { %1739 = vmatmul.mubr.msk.bf16.vlgmr.msra.gmra.mrb[28].mxu0 %vm505_vm0, %v1266_v39 }
 0x977   : > { %v1327_v49 = vpop.f32.mrb[28].mxu0 }
 0x978   : > { %v1328_v50 = vadd.f32 %v1597_v48, %v1327_v49  ;;  %v1740_v51 = vpop.f32.mrb[29].mxu0 }
 0x979   : > { %v1330_v52 = vpop.f32.mrb[30].mxu0 }
 0x97a   : > { %v1333_v53 = vmul.f32 %v1328_v50, %v1328_v50  ;;  %v1741_v54 = vpop.f32.mrb[31].mxu0 }
 0x97c   : > { %v1334_v55 = vmul.f32 %v1333_v53, %v1328_v50 }
 0x97e   : > { %v1335_v56 = vmul.f32 0.044715, %v1334_v55 }
 0x980   : > { %v1336_v57 = vadd.f32 %v1335_v56, %v1328_v50 }
 0x982   : > { %v1337_v58 = vmul.f32 0.7978846, %v1336_v57 }
 0x984   : > { %1878 = vtanh.f32 %v1337_v58 }
 0x98e   : > { %v1879_v59 = vpop.eup %1878 }
 0x98f   : > { %v1339_v8 = vadd.f32 1.0, %v1879_v59 }
 0x991   : > { %v1340_v60 = vmul.f32 0.5, %v1339_v8 }
 0x993   : > { %v1341_v61 = vmul.f32 %v1340_v60, %v1328_v50 }
 0x995   : > { %v1342_v62 = vpack.c.bf16 %v1341_v61, %v1341_v61 }
 0x997   : > { %1759 = vmatmul.mubr.bf16.vlgmr.msra.gmra.mrb[20].mxu1 %v1342_v62 }
 0xa6a   : > { %v1448_v1 = vpop.f32.mrb[20].mxu1 }
 0xa6b   : > { %v1449_v2 = vadd.f32 %v1601_v63, %v1448_v1  ;;  %v1760_v3 = vpop.f32.mrb[21].mxu1 }
 0xa6c   : > { %v1451_v4 = vpop.f32.mrb[22].mxu1 }
 0xa6d   : > { %v1454_v5 = vadd.f32 %v1449_v2, %v2402_v21  ;;  %v1761_v6 = vpop.f32.mrb[23].mxu1 }
 0xa6f   : > { %1455 = vst.msk [vmem:[%s496_s19] sm:$0xff] %vm505_vm0, %v1454_v5 }
 0xa70   : > { %1977 = shalt.err (!%p1974_p11)
}
 0xa71   : > { %s1978_s15 = scalar_lea.hbm %s2459_s24, 128  ;;  %s1982_s23 = scalar_lea.hbm %s2548_s25, 256 }
 0xa72   : > { %p1979_p13 = scmp.ne.s32.totalorder %s2459_s24, %s1978_s15  ;;  %p1983_p6 = scmp.lt.u32.totalorder %s2459_s24, %s2548_s25 }
 0xa73   : > { %p1984_p5 = scmp.lt.u32.totalorder %s1982_s23, %s1978_s15  ;;  %p1986_p12 = scmp.lt.u32.totalorder %s1978_s15, %s2459_s24 }
 0xa74   : > { %p1980_p0 = pnand %p1979_p13, %p2549_p10 }
 0xa75   : > { %p1985_p9 = por %p1984_p5, %p1983_p6 }
 0xa76   : > { %p1981_p1 = pneg %p1980_p0 }
 0xa77   : > { %p1987_p2 = por %p1986_p12, %p1985_p9 }
 0xa79   : > { %p1988_p3 = pnand %p1987_p2, %p1981_p1 }
 0xa7b   : > { %1991 = shalt.err (!%p1988_p3)
}
 0xa7c   : > { %1774 = dma.vmem_to_hbm [thread:$0]  (%p2549_p10), %s2461_s20, 128, %s2459_s24, %s1457_s17  }
 0xa7d PF: > { %s2550_s28 = sld [smem:[#allocation14_spill]]  ;;  %s2551_s16 = sld [smem:[#allocation12_spill]] }
 0xa7e   : > { %s2552_s26 = sld [smem:[#allocation18_spill]] }
 0xa83   : > { %p1796_p4 = scmp.ge.s32.totalorder %s2550_s28, 2  ;;  %s1482_s21 = sand.u32 1, %s2551_s16  }
 0xa84   : > { %p2553_p7 = scmp.ne.s32.totalorder %s2552_s26, 0  ;;  %s1483_s29 = scalar_lea.sflag [#allocation4], %s1482_s21 }
 0xa86   : > { %p1787_p8 = pnand %p1796_p4, %p2553_p7 }
 0xa88   : > { %2017 = dma.done.wait (!%p1787_p8), %s1483_s29, 128  }
 0xa89   : > { %2019 = vsyncadd (!%p1787_p8), %s1483_s29, 4294967168  ;;  %s2554_s16 = sld [smem:[#allocation15_spill]]  ;;  %s2555_s15 = sld [smem:[#allocation13_spill]] }
 0xa8a   : > { %s2556_s27 = sld [smem:[#allocation16_spill]]  ;;  %s2557_s29 = smov %s2026_s30 }
 0xa8f   : > { %p26_p11 = scmp.ge.s32.totalorder %s2554_s16, 4   ;;  %s2558_s30 = smov %s2555_s15 }
 0xa90   : > { %s2559_s15 = smov %s2556_s27 }
 0xa91   :  { %28 = sbr.rel (!%p26_p11) target bundleno = 7 (0x7), region = 124 }
 0xa98   :  { %1488 = vsyncpa [#allocation3], 1 }
 0xa99   :  { %1490 = vsyncpa [#allocation3 + $0x1], 1 }
 0xa9a   :  { %1491 = vsyncpa [#allocation6], 1 }
 0xa9b   :  { %1492 = vsyncpa [#allocation4], 1 }
 0xa9c   :  { %1494 = vsyncpa [#allocation4 + $0x1], 1 }

</bundles_post_ra>
